<compile_context>
chip_gen: v6e
topology: v6e:2x2x1
jax: 0.10.0
libtpu: 0.0.40
codegen_flags: <defaults>
</compile_context>

<pallas_src>
import jax
import jax.numpy as jnp
import numpy as np
from jax.experimental import pallas as pl
from jax.experimental.pallas import tpu as pltpu


def _node_area_kernel(xy_ref, sx_ref, sy_ref, bxb_ref, byb_ref, u_ref, out_ref):
    """One node tile: out[0, n] = sum_{bx,by} ox[bx, n] * u[bx, by] * oy[by, n]."""
    x_min = xy_ref[0:1, :]                       # (1, TN)   nodes on the lane axis
    y_min = xy_ref[1:2, :]                       # (1, TN)
    x_max = x_min + sx_ref[...]                  # (1, TN)
    y_max = y_min + sy_ref[...]                  # (1, TN)

    bin_xl = bxb_ref[:, 0:1]                     # (Bx, 1)
    bin_xh = bxb_ref[:, 1:2]                     # (Bx, 1)
    bin_yl = byb_ref[:, 0:1]                     # (By, 1)
    bin_yh = byb_ref[:, 1:2]                     # (By, 1)

    # Clamped 1-D overlaps; bins on sublanes, nodes on lanes (VPU work, hidden under
    # the MXU contraction for realistic route-map sizes).
    ox = jnp.maximum(jnp.minimum(x_max, bin_xh) - jnp.maximum(x_min, bin_xl), 0.0)  # (Bx, TN)
    oy = jnp.maximum(jnp.minimum(y_max, bin_yh) - jnp.maximum(y_min, bin_yl), 0.0)  # (By, TN)

    dims = (((1,), (0,)), ((), ()))
    u = u_ref[...]                               # (Bx, By)
    if u.dtype == jnp.bfloat16:
        # Explicit bf16 operands -> deterministic single-pass MXU matmul, f32 accumulate.
        t = jax.lax.dot_general(u, oy.astype(jnp.bfloat16), dims,
                                preferred_element_type=jnp.float32)                 # (Bx, TN)
    else:
        # Bit-fidelity path: full-precision f32 matmul, pinned explicitly.
        t = jax.lax.dot_general(u, oy, dims,
                                preferred_element_type=jnp.float32,
                                precision=jax.lax.Precision.HIGHEST)                # (Bx, TN)

    # Cross-sublane (XLU) reduce over Bx. If profiling ever shows this on the critical
    # path (tiny By, large Bx), replace it with ones((1, Bx)) @ (ox * t) on the MXU.
    out_ref[...] = jnp.sum(ox * t, axis=0, keepdims=True)                           # (1, TN)


def _round_up(x, m):
    return (x + m - 1) // m * m


def _auto_tile_n(num_movable_nodes, num_bins_x, num_bins_y):
    """Pick the node-tile width (lane axis) based on route-map size and node count."""
    map_bytes = num_bins_x * num_bins_y * 4
    if map_bytes >= (8 << 20):
        cap = 512    # huge maps: bound the (Bx,TN)/(By,TN) intermediates (v7x: 64 MiB VMEM)
    elif map_bytes >= (1 << 20):
        cap = 1024
    else:
        cap = 2048   # small maps are step-overhead bound: big tiles (v5e/v6e: 128 MiB VMEM)
    # Keep the "parallel" node axis at >= 2 grid steps when possible so it can shard
    # across v7x's two TensorCores instead of collapsing to a 1-step grid.
    half = _round_up(max(pl.cdiv(num_movable_nodes, 2), 128), 128)
    return max(128, min(cap, half))


def compute_node_area_from_route_map(pos, node_size_x, node_size_y, utilization_map,
                                     *, xl, yl, xh, yh, num_movable_nodes,
                                     num_bins_x, num_bins_y,
                                     tile_n=None, use_bf16_mxu=True):
    """JAX/Pallas equivalent of ComputeNodeAreaFromRouteMap.forward.

    pos: (2 * num_nodes,) float32, x coords then y coords.
    node_size_x, node_size_y: (num_nodes,) float32.
    utilization_map: (num_bins_x, num_bins_y) float32.
    Returns: (num_movable_nodes,) float32 instance route areas.
    """
    num_nodes = node_size_x.shape[0]
    bin_size_x = (xh - xl) / num_bins_x
    bin_size_y = (yh - yl) / num_bins_y

    if tile_n is None:
        tile_n = _auto_tile_n(num_movable_nodes, num_bins_x, num_bins_y)
    grid_n = pl.cdiv(num_movable_nodes, tile_n)

    # No stack/pad HBM round trip on the node data: pos is contiguous [x..., y...], so a
    # (2, num_nodes) view is free, and the sizes are fed as free (1, num_nodes) views.
    # The ragged tail (num_movable_nodes % tile_n) is handled by Pallas' masked edge
    # blocks; extra lanes hold fixed-node / stale data and are never read back.
    xy = pos.astype(jnp.float32).reshape(2, num_nodes)
    sx = node_size_x.astype(jnp.float32).reshape(1, num_nodes)
    sy = node_size_y.astype(jnp.float32).reshape(1, num_nodes)

    # Bin boundaries precomputed once in the wrapper (tiny); resident blocks in the kernel.
    bx_lo = xl + jnp.arange(num_bins_x, dtype=jnp.float32) * bin_size_x
    by_lo = yl + jnp.arange(num_bins_y, dtype=jnp.float32) * bin_size_y
    bx_bounds = jnp.stack([bx_lo, bx_lo + bin_size_x], axis=1)                 # (Bx, 2)
    by_bounds = jnp.stack([by_lo, by_lo + bin_size_y], axis=1)                 # (By, 2)

    # bf16 route map halves its HBM read and resident VMEM; the MXU accumulates in f32.
    u_dtype = jnp.bfloat16 if use_bf16_mxu else jnp.float32
    u = utilization_map.astype(u_dtype)

    # VMEM budget from the actual buffers (+ headroom), capped below physical per-core
    # VMEM (64 MiB on v7x, 128 MiB on v5e/v6e) instead of a flat 64 MiB request.
    u_bytes = num_bins_x * num_bins_y * u.dtype.itemsize
    node_blocks = 4 * tile_n * 4 * 2                      # xy/sx/sy blocks, double-buffered
    out_blocks = tile_n * 4 * 2
    bound_blocks = (num_bins_x + num_bins_y) * 2 * 4 * 2
    intermediates = (2 * num_bins_x + num_bins_y) * tile_n * 4 + num_bins_y * tile_n * 2
    needed = 2 * u_bytes + node_blocks + out_blocks + bound_blocks + intermediates
    try:
        physical_vmem = int(pltpu.get_tpu_info().vmem_capacity_bytes)
    except Exception:
        physical_vmem = 64 << 20                          # conservative: v7x per-core VMEM
    vmem_limit = int(min(max(2 * needed + (8 << 20), 32 << 20), int(physical_vmem * 0.85)))

    cost = pl.CostEstimate(
        flops=2 * num_bins_x * num_bins_y * grid_n * tile_n,
        transcendentals=0,
        bytes_accessed=(16 * num_movable_nodes            # node coords + sizes
                        + u_bytes                         # route map
                        + (num_bins_x + num_bins_y) * 8   # bin bounds
                        + 4 * num_movable_nodes),         # output
    )

    def build_in_specs(single_buffer_resident):
        # Resident blocks (constant index_map) never get re-fetched; Buffered(1) drops
        # their second (dead) VMEM buffer — for a 2048x2048 map that saves a full map copy.
        resident_kwargs = (
            dict(pipeline_mode=pl.Buffered(1)) if single_buffer_resident else {}
        )
        return [
            pl.BlockSpec((2, tile_n), lambda i: (0, i)),                        # x/y mins
            pl.BlockSpec((1, tile_n), lambda i: (0, i)),                        # size_x
            pl.BlockSpec((1, tile_n), lambda i: (0, i)),                        # size_y
            pl.BlockSpec((num_bins_x, 2), lambda i: (0, 0), **resident_kwargs),  # bin x bounds
            pl.BlockSpec((num_bins_y, 2), lambda i: (0, 0), **resident_kwargs),  # bin y bounds
            pl.BlockSpec((num_bins_x, num_bins_y), lambda i: (0, 0), **resident_kwargs),  # U
        ]

    def run(single_buffer_resident):
        return pl.pallas_call(
            _node_area_kernel,
            out_shape=jax.ShapeDtypeStruct((1, num_movable_nodes), jnp.float32),
            grid_spec=pltpu.PrefetchScalarGridSpec(
                num_scalar_prefetch=0,
                grid=(grid_n,),
                in_specs=build_in_specs(single_buffer_resident),
                out_specs=pl.BlockSpec((1, tile_n), lambda i: (0, i)),          # lane-dense out
            ),
            compiler_params=pltpu.CompilerParams(
                dimension_semantics=("parallel",),
                vmem_limit_bytes=vmem_limit,
            ),
            cost_estimate=cost,
        )(xy, sx, sy, bx_bounds, by_bounds, u)

    try:
        out = run(single_buffer_resident=True)
    except Exception:
        # pl.Buffered(1) not accepted by this JAX/Mosaic build -> proven double-buffered path.
        out = run(single_buffer_resident=False)

    return out[0]


def _reference_numpy(pos, sx, sy, u, xl, yl, xh, yh, num_movable_nodes, nbx, nby):
    """Straight port of the C++ loop for verification."""
    bsx = (xh - xl) / nbx
    bsy = (yh - yl) / nby
    num_nodes = sx.shape[0]
    out = np.zeros(num_movable_nodes, dtype=np.float64)
    for i in range(num_movable_nodes):
        x_min = pos[i]; x_max = x_min + sx[i]
        y_min = pos[num_nodes + i]; y_max = y_min + sy[i]
        bxl = max(int((x_min - xl) / bsx), 0)
        bxh = min(int((x_max - xl) / bsx) + 1, nbx)
        byl = max(int((y_min - yl) / bsy), 0)
        byh = min(int((y_max - yl) / bsy) + 1, nby)
        acc = 0.0
        for bx in range(bxl, bxh):
            for by in range(byl, byh):
                ov = (min(x_max, xl + (bx + 1) * bsx) - max(x_min, xl + bx * bsx)) * \
                     (min(y_max, yl + (by + 1) * bsy) - max(y_min, yl + by * bsy))
                acc += ov * u[bx, by]
        out[i] = acc
    return out.astype(np.float32)


if __name__ == "__main__":
    # Small deterministic problem.
    xl, yl, xh, yh = 0.0, 0.0, 16.0, 16.0
    num_bins_x, num_bins_y = 16, 16
    num_nodes = 300
    num_movable_nodes = 200

    key = jax.random.PRNGKey(0)
    k1, k2, k3, k4, k5 = jax.random.split(key, 5)

    node_size_x = jax.random.uniform(k1, (num_nodes,), jnp.float32, 0.5, 3.0)
    node_size_y = jax.random.uniform(k2, (num_nodes,), jnp.float32, 0.5, 3.0)
    # Keep nodes inside the placement region.
    pos_x = jax.random.uniform(k3, (num_nodes,), jnp.float32, xl, xh - 3.0)
    pos_y = jax.random.uniform(k4, (num_nodes,), jnp.float32, yl, yh - 3.0)
    pos = jnp.concatenate([pos_x, pos_y])
    utilization_map = jax.random.uniform(k5, (num_bins_x, num_bins_y), jnp.float32, 0.0, 2.0)

    out = compute_node_area_from_route_map(
        pos, node_size_x, node_size_y, utilization_map,
        xl=xl, yl=yl, xh=xh, yh=yh,
        num_movable_nodes=num_movable_nodes,
        num_bins_x=num_bins_x, num_bins_y=num_bins_y,
        use_bf16_mxu=True,                       # single-pass MXU path (default)
    )
    out = jax.block_until_ready(out)

    ref = _reference_numpy(
        np.asarray(pos), np.asarray(node_size_x), np.asarray(node_size_y),
        np.asarray(utilization_map), xl, yl, xh, yh,
        num_movable_nodes, num_bins_x, num_bins_y,
    )
    # bf16 MXU operands -> ~0.4% per-operand rounding; 3% tolerance leaves wide margin.
    np.testing.assert_allclose(np.asarray(out), ref, rtol=3e-2, atol=3e-2)
    print("KERNEL_OK")
</pallas_src>

<mosaic_0001>
module attributes {stable_mosaic.version = 11 : i64} {
  func.func @_node_area_kernel(%arg0: i32, %arg1: memref<2x128xf32, #tpu.memory_space<vmem>>, %arg2: memref<1x128xf32, #tpu.memory_space<vmem>>, %arg3: memref<1x128xf32, #tpu.memory_space<vmem>>, %arg4: memref<16x2xf32, #tpu.memory_space<vmem>>, %arg5: memref<16x2xf32, #tpu.memory_space<vmem>>, %arg6: memref<16x16xbf16, #tpu.memory_space<vmem>>, %arg7: memref<1x128xf32, #tpu.memory_space<vmem>>) attributes {dimension_semantics = [#tpu.dimension_semantics<parallel>], iteration_bounds = array<i64: 2>, scalar_prefetch = 0 : i64, scratch_operands = 0 : i64, tpu.core_type = #tpu.core_type<tc>, window_params = [{transform_indices = @transform_0, window_bounds = array<i64: 2, 128>}, {transform_indices = @transform_1, window_bounds = array<i64: 1, 128>}, {transform_indices = @transform_2, window_bounds = array<i64: 1, 128>}, {pipeline_mode = #tpu.pipeline_mode<synchronous>, transform_indices = @transform_3, window_bounds = array<i64: 16, 2>}, {pipeline_mode = #tpu.pipeline_mode<synchronous>, transform_indices = @transform_4, window_bounds = array<i64: 16, 2>}, {pipeline_mode = #tpu.pipeline_mode<synchronous>, transform_indices = @transform_5, window_bounds = array<i64: 16, 16>}, {transform_indices = @transform_6, window_bounds = array<i64: 1, 128>}]} {
    %c0 = arith.constant 0 : index
    %c0_0 = arith.constant 0 : index
    %0 = vector.load %arg1[%c0, %c0_0] : memref<2x128xf32, #tpu.memory_space<vmem>>, vector<1x128xf32>
    %c1 = arith.constant 1 : index
    %c0_1 = arith.constant 0 : index
    %1 = vector.load %arg1[%c1, %c0_1] : memref<2x128xf32, #tpu.memory_space<vmem>>, vector<1x128xf32>
    %c0_2 = arith.constant 0 : index
    %c0_3 = arith.constant 0 : index
    %2 = vector.load %arg2[%c0_2, %c0_3] : memref<1x128xf32, #tpu.memory_space<vmem>>, vector<1x128xf32>
    %3 = arith.addf %0, %2 : vector<1x128xf32>
    %c0_4 = arith.constant 0 : index
    %c0_5 = arith.constant 0 : index
    %4 = vector.load %arg3[%c0_4, %c0_5] : memref<1x128xf32, #tpu.memory_space<vmem>>, vector<1x128xf32>
    %5 = arith.addf %1, %4 : vector<1x128xf32>
    %c0_6 = arith.constant 0 : index
    %c0_7 = arith.constant 0 : index
    %6 = vector.load %arg4[%c0_6, %c0_7] : memref<16x2xf32, #tpu.memory_space<vmem>>, vector<16x1xf32>
    %c0_8 = arith.constant 0 : index
    %c1_9 = arith.constant 1 : index
    %7 = vector.load %arg4[%c0_8, %c1_9] : memref<16x2xf32, #tpu.memory_space<vmem>>, vector<16x1xf32>
    %c0_10 = arith.constant 0 : index
    %c0_11 = arith.constant 0 : index
    %8 = vector.load %arg5[%c0_10, %c0_11] : memref<16x2xf32, #tpu.memory_space<vmem>>, vector<16x1xf32>
    %c0_12 = arith.constant 0 : index
    %c1_13 = arith.constant 1 : index
    %9 = vector.load %arg5[%c0_12, %c1_13] : memref<16x2xf32, #tpu.memory_space<vmem>>, vector<16x1xf32>
    %10 = vector.broadcast %3 : vector<1x128xf32> to vector<16x128xf32>
    %11 = vector.broadcast %7 : vector<16x1xf32> to vector<16x128xf32>
    %12 = arith.minimumf %10, %11 : vector<16x128xf32>
    %13 = vector.broadcast %0 : vector<1x128xf32> to vector<16x128xf32>
    %14 = vector.broadcast %6 : vector<16x1xf32> to vector<16x128xf32>
    %15 = arith.maximumf %13, %14 : vector<16x128xf32>
    %16 = arith.subf %12, %15 : vector<16x128xf32>
    %cst = arith.constant 0.000000e+00 : f32
    %17 = vector.broadcast %cst : f32 to vector<16x128xf32>
    %18 = arith.maximumf %16, %17 : vector<16x128xf32>
    %19 = vector.broadcast %5 : vector<1x128xf32> to vector<16x128xf32>
    %20 = vector.broadcast %9 : vector<16x1xf32> to vector<16x128xf32>
    %21 = arith.minimumf %19, %20 : vector<16x128xf32>
    %22 = vector.broadcast %1 : vector<1x128xf32> to vector<16x128xf32>
    %23 = vector.broadcast %8 : vector<16x1xf32> to vector<16x128xf32>
    %24 = arith.maximumf %22, %23 : vector<16x128xf32>
    %25 = arith.subf %21, %24 : vector<16x128xf32>
    %cst_14 = arith.constant 0.000000e+00 : f32
    %26 = vector.broadcast %cst_14 : f32 to vector<16x128xf32>
    %27 = arith.maximumf %25, %26 : vector<16x128xf32>
    %c0_15 = arith.constant 0 : index
    %c0_16 = arith.constant 0 : index
    %28 = vector.load %arg6[%c0_15, %c0_16] : memref<16x16xbf16, #tpu.memory_space<vmem>>, vector<16x16xbf16>
    %29 = arith.truncf %27 : vector<16x128xf32> to vector<16x128xbf16>
    %cst_17 = arith.constant dense<0.000000e+00> : vector<16x128xf32>
    %30 = tpu.matmul %28, %29, %cst_17 {dimension_numbers = #tpu.dot_dimension_numbers<[1], [0], [0], [1], [0, 0, 1, 1], [], []>} : vector<16x16xbf16>, vector<16x128xbf16>, vector<16x128xf32> -> vector<16x128xf32>
    %31 = arith.mulf %18, %30 : vector<16x128xf32>
    %cst_18 = arith.constant dense<0.000000e+00> : vector<128xf32>
    %32 = vector.multi_reduction <add>, %31, %cst_18 [0] : vector<16x128xf32> to vector<128xf32>
    %33 = vector.shape_cast %32 : vector<128xf32> to vector<1x128xf32>
    %c0_19 = arith.constant 0 : index
    %c0_20 = arith.constant 0 : index
    %34 = vector.load %arg7[%c0_19, %c0_20] : memref<1x128xf32, #tpu.memory_space<vmem>>, vector<1x128xf32>
    tpu.vector_store %arg7[%c0_19, %c0_20], %33 {strides = array<i32>} : memref<1x128xf32, #tpu.memory_space<vmem>>, vector<1x128xf32>,
    return
  }
  func.func @transform_0(%arg0: i32) -> (i32, i32) {
    %c0_i32 = arith.constant 0 : i32
    %c0_i32_0 = arith.constant 0 : i32
    return %c0_i32, %arg0 : i32, i32
  }
  func.func @transform_1(%arg0: i32) -> (i32, i32) {
    %c0_i32 = arith.constant 0 : i32
    %c0_i32_0 = arith.constant 0 : i32
    return %c0_i32, %arg0 : i32, i32
  }
  func.func @transform_2(%arg0: i32) -> (i32, i32) {
    %c0_i32 = arith.constant 0 : i32
    %c0_i32_0 = arith.constant 0 : i32
    return %c0_i32, %arg0 : i32, i32
  }
  func.func @transform_3(%arg0: i32) -> (i32, i32) {
    %c0_i32 = arith.constant 0 : i32
    %c0_i32_0 = arith.constant 0 : i32
    %c0_i32_1 = arith.constant 0 : i32
    return %c0_i32, %c0_i32_0 : i32, i32
  }
  func.func @transform_4(%arg0: i32) -> (i32, i32) {
    %c0_i32 = arith.constant 0 : i32
    %c0_i32_0 = arith.constant 0 : i32
    %c0_i32_1 = arith.constant 0 : i32
    return %c0_i32, %c0_i32_0 : i32, i32
  }
  func.func @transform_5(%arg0: i32) -> (i32, i32) {
    %c0_i32 = arith.constant 0 : i32
    %c0_i32_0 = arith.constant 0 : i32
    %c0_i32_1 = arith.constant 0 : i32
    return %c0_i32, %c0_i32_0 : i32, i32
  }
  func.func @transform_6(%arg0: i32) -> (i32, i32) {
    %c0_i32 = arith.constant 0 : i32
    %c0_i32_0 = arith.constant 0 : i32
    return %c0_i32, %arg0 : i32, i32
  }
}

module attributes {stable_mosaic.version = 11 : i64} {
  func.func @_node_area_kernel(%arg0: i32, %arg1: memref<2x128xf32, #tpu.memory_space<vmem>>, %arg2: memref<1x128xf32, #tpu.memory_space<vmem>>, %arg3: memref<1x128xf32, #tpu.memory_space<vmem>>, %arg4: memref<16x2xf32, #tpu.memory_space<vmem>>, %arg5: memref<16x2xf32, #tpu.memory_space<vmem>>, %arg6: memref<16x16xbf16, #tpu.memory_space<vmem>>, %arg7: memref<1x128xf32, #tpu.memory_space<vmem>>) attributes {dimension_semantics = [#tpu.dimension_semantics<parallel>], iteration_bounds = array<i64: 2>, scalar_prefetch = 0 : i64, scratch_operands = 0 : i64, tpu.core_type = #tpu.core_type<tc>, window_params = [{transform_indices = @transform_0, window_bounds = array<i64: 2, 128>}, {transform_indices = @transform_1, window_bounds = array<i64: 1, 128>}, {transform_indices = @transform_2, window_bounds = array<i64: 1, 128>}, {pipeline_mode = #tpu.pipeline_mode<synchronous>, transform_indices = @transform_3, window_bounds = array<i64: 16, 2>}, {pipeline_mode = #tpu.pipeline_mode<synchronous>, transform_indices = @transform_4, window_bounds = array<i64: 16, 2>}, {pipeline_mode = #tpu.pipeline_mode<synchronous>, transform_indices = @transform_5, window_bounds = array<i64: 16, 16>}, {transform_indices = @transform_6, window_bounds = array<i64: 1, 128>}]} {
    %c0 = arith.constant 0 : index
    %c0_0 = arith.constant 0 : index
    %0 = vector.load %arg1[%c0, %c0_0] : memref<2x128xf32, #tpu.memory_space<vmem>>, vector<1x128xf32>
    %c1 = arith.constant 1 : index
    %c0_1 = arith.constant 0 : index
    %1 = vector.load %arg1[%c1, %c0_1] : memref<2x128xf32, #tpu.memory_space<vmem>>, vector<1x128xf32>
    %c0_2 = arith.constant 0 : index
    %c0_3 = arith.constant 0 : index
    %2 = vector.load %arg2[%c0_2, %c0_3] : memref<1x128xf32, #tpu.memory_space<vmem>>, vector<1x128xf32>
    %3 = arith.addf %0, %2 : vector<1x128xf32>
    %c0_4 = arith.constant 0 : index
    %c0_5 = arith.constant 0 : index
    %4 = vector.load %arg3[%c0_4, %c0_5] : memref<1x128xf32, #tpu.memory_space<vmem>>, vector<1x128xf32>
    %5 = arith.addf %1, %4 : vector<1x128xf32>
    %c0_6 = arith.constant 0 : index
    %c0_7 = arith.constant 0 : index
    %6 = vector.load %arg4[%c0_6, %c0_7] : memref<16x2xf32, #tpu.memory_space<vmem>>, vector<16x1xf32>
    %c0_8 = arith.constant 0 : index
    %c1_9 = arith.constant 1 : index
    %7 = vector.load %arg4[%c0_8, %c1_9] : memref<16x2xf32, #tpu.memory_space<vmem>>, vector<16x1xf32>
    %c0_10 = arith.constant 0 : index
    %c0_11 = arith.constant 0 : index
    %8 = vector.load %arg5[%c0_10, %c0_11] : memref<16x2xf32, #tpu.memory_space<vmem>>, vector<16x1xf32>
    %c0_12 = arith.constant 0 : index
    %c1_13 = arith.constant 1 : index
    %9 = vector.load %arg5[%c0_12, %c1_13] : memref<16x2xf32, #tpu.memory_space<vmem>>, vector<16x1xf32>
    %10 = vector.broadcast %3 : vector<1x128xf32> to vector<16x128xf32>
    %11 = vector.broadcast %7 : vector<16x1xf32> to vector<16x128xf32>
    %12 = arith.minimumf %10, %11 : vector<16x128xf32>
    %13 = vector.broadcast %0 : vector<1x128xf32> to vector<16x128xf32>
    %14 = vector.broadcast %6 : vector<16x1xf32> to vector<16x128xf32>
    %15 = arith.maximumf %13, %14 : vector<16x128xf32>
    %16 = arith.subf %12, %15 : vector<16x128xf32>
    %cst = arith.constant 0.000000e+00 : f32
    %17 = vector.broadcast %cst : f32 to vector<16x128xf32>
    %18 = arith.maximumf %16, %17 : vector<16x128xf32>
    %19 = vector.broadcast %5 : vector<1x128xf32> to vector<16x128xf32>
    %20 = vector.broadcast %9 : vector<16x1xf32> to vector<16x128xf32>
    %21 = arith.minimumf %19, %20 : vector<16x128xf32>
    %22 = vector.broadcast %1 : vector<1x128xf32> to vector<16x128xf32>
    %23 = vector.broadcast %8 : vector<16x1xf32> to vector<16x128xf32>
    %24 = arith.maximumf %22, %23 : vector<16x128xf32>
    %25 = arith.subf %21, %24 : vector<16x128xf32>
    %cst_14 = arith.constant 0.000000e+00 : f32
    %26 = vector.broadcast %cst_14 : f32 to vector<16x128xf32>
    %27 = arith.maximumf %25, %26 : vector<16x128xf32>
    %c0_15 = arith.constant 0 : index
    %c0_16 = arith.constant 0 : index
    %28 = vector.load %arg6[%c0_15, %c0_16] : memref<16x16xbf16, #tpu.memory_space<vmem>>, vector<16x16xbf16>
    %29 = arith.truncf %27 : vector<16x128xf32> to vector<16x128xbf16>
    %cst_17 = arith.constant dense<0.000000e+00> : vector<16x128xf32>
    %30 = tpu.matmul %28, %29, %cst_17 {dimension_numbers = #tpu.dot_dimension_numbers<[1], [0], [0], [1], [0, 0, 1, 1], [], []>} : vector<16x16xbf16>, vector<16x128xbf16>, vector<16x128xf32> -> vector<16x128xf32>
    %31 = arith.mulf %18, %30 : vector<16x128xf32>
    %cst_18 = arith.constant dense<0.000000e+00> : vector<128xf32>
    %32 = vector.multi_reduction <add>, %31, %cst_18 [0] : vector<16x128xf32> to vector<128xf32>
    %33 = vector.shape_cast %32 : vector<128xf32> to vector<1x128xf32>
    %c0_19 = arith.constant 0 : index
    %c0_20 = arith.constant 0 : index
    %34 = vector.load %arg7[%c0_19, %c0_20] : memref<1x128xf32, #tpu.memory_space<vmem>>, vector<1x128xf32>
    tpu.vector_store %arg7[%c0_19, %c0_20], %33 {strides = array<i32>} : memref<1x128xf32, #tpu.memory_space<vmem>>, vector<1x128xf32>,
    return
  }
  func.func @transform_0(%arg0: i32) -> (i32, i32) {
    %c0_i32 = arith.constant 0 : i32
    %c0_i32_0 = arith.constant 0 : i32
    return %c0_i32, %arg0 : i32, i32
  }
  func.func @transform_1(%arg0: i32) -> (i32, i32) {
    %c0_i32 = arith.constant 0 : i32
    %c0_i32_0 = arith.constant 0 : i32
    return %c0_i32, %arg0 : i32, i32
  }
  func.func @transform_2(%arg0: i32) -> (i32, i32) {
    %c0_i32 = arith.constant 0 : i32
    %c0_i32_0 = arith.constant 0 : i32
    return %c0_i32, %arg0 : i32, i32
  }
  func.func @transform_3(%arg0: i32) -> (i32, i32) {
    %c0_i32 = arith.constant 0 : i32
    %c0_i32_0 = arith.constant 0 : i32
    %c0_i32_1 = arith.constant 0 : i32
    return %c0_i32, %c0_i32_0 : i32, i32
  }
  func.func @transform_4(%arg0: i32) -> (i32, i32) {
    %c0_i32 = arith.constant 0 : i32
    %c0_i32_0 = arith.constant 0 : i32
    %c0_i32_1 = arith.constant 0 : i32
    return %c0_i32, %c0_i32_0 : i32, i32
  }
  func.func @transform_5(%arg0: i32) -> (i32, i32) {
    %c0_i32 = arith.constant 0 : i32
    %c0_i32_0 = arith.constant 0 : i32
    %c0_i32_1 = arith.constant 0 : i32
    return %c0_i32, %c0_i32_0 : i32, i32
  }
  func.func @transform_6(%arg0: i32) -> (i32, i32) {
    %c0_i32 = arith.constant 0 : i32
    %c0_i32_0 = arith.constant 0 : i32
    return %c0_i32, %arg0 : i32, i32
  }
}

</mosaic_0001>

<bundles_post_ra>
// kernel: tpu_custom_call.1
= control target key start
LH: loop header
LB: loop body
LE: loop exit
PB: predicated region body
PF: predicated region fallthrough
CT: control target
= control target key end

     0   :  { %11 = vsyncpa [#allocation3], 0  ;;  %s784_s0 = inlined_call_operand.vmem [shape: f32[2,300], index: 0, kind: input, shape index: {}]   ;;  %s785_s1 = inlined_call_operand.vmem [shape: f32[1,300], index: 1, kind: input, shape index: {}]   ;;  %s786_s2 = inlined_call_operand.vmem [shape: f32[1,300], index: 2, kind: input, shape index: {}]   ;;  %s787_s3 = inlined_call_operand.vmem [shape: f32[16,2], index: 3, kind: input, shape index: {}]   ;;  %s788_s4 = inlined_call_operand.vmem [shape: f32[16,2], index: 4, kind: input, shape index: {}]   ;;  %s789_s5 = inlined_call_operand.vmem [shape: bf16[16,16], index: 5, kind: input, shape index: {}]   ;;  %s790_s6 = inlined_call_operand.hbm [shape: f32[1,200], index: 6, kind: output, shape index: {}]  }
   0x1   :  { %13 = vsyncpa [#allocation3 + $0x1], 0  ;;  %s671_s21 = smov 0   ;;  %s673_s22 = smov 0  }
   0x2   :  { %s675_s23 = smov 0   ;;  %s677_s24 = smov 0  }
   0x3 LB: > { %s692_s25 = sadd.s32 4294967295, %s629_s24   ;;  %s502_s26 = sadd.s32 4294967294, %s629_s24   ;;  %s629_s24 = sphi %s677_s24, %s796_s24   ;;  %s625_s23 = sphi %s675_s23, %s795_s23   ;;  %s621_s22 = sphi %s673_s22, %s794_s22   ;;  %s617_s21 = sphi %s671_s21, %s793_s21  }
   0x4   : > { %s696_s27 = sadd.s32 1, %s629_s24   ;;  %s167_s28 = sadd.s32 1, %s625_s23 }
   0x5   : > { %s164_s29 = ssub.s32 %s629_s24, %s696_s27  ;;  %p177_p0 = scmp.ne.s32.totalorder %s625_s23, %s621_s22 }
   0x6   : > { %p165_p1 = scmp.eq.s32.totalorder %s164_s29, 0  ;;  %p178_p2 = scmp.eq.s32.totalorder %s692_s25, 1 }
   0x7   : > { %p183_p3 = scmp.ne.s32.totalorder %s621_s22, %s617_s21  ;;  %p184_p4 = scmp.eq.s32.totalorder %s502_s26, 1 }
   0x8   : > { %s707_s30 = scalar_select %p165_p1, %s625_s23, %s167_s28  }
   0x9   : > { %p709_p5 = por %p178_p2, %p177_p0  ;;  %p713_p6 = por %p184_p4, %p183_p3 }
   0xa   : > { %p505_p7 = scmp.ge.s32.totalorder %s629_s24, 1  ;;  %p230_p8 = scmp.lt.s32.totalorder %s629_s24, 3 }
   0xc   : > { %p231_p9 = pnand %p505_p7, %p230_p8 }
   0xd   : > { %p264_p10 = scmp.lt.s32.totalorder (!%p231_p9), %s692_s25, 2  ;;  %s262_s15 = sand.u32 (!%p231_p9), 1, %s621_s22  }
   0xe   : > { %234 = sbr.rel (%p231_p9) target bundleno = 386 (0x182), region = 44  ;;  %s509_s16 = sshll.u32 (!%p231_p9), %s692_s25, 4 }
   0xf   : > { %s427_s26 = scalar_lea.hbm (!%p231_p9), %s790_s6, %s509_s16  ;;  %s417_s28 = scalar_lea.sflag (!%p231_p9), [#allocation3], %s262_s15 }
  0x10   : > { %s635_s9 = smov (!%p231_p9), [#allocation2]  }
  0x11   : > { %s573_s10 = sshll.u32 (!%p231_p9), %s635_s9, 4  ;;  %s574_s10 = int_to_ptr.vmem [resolvable:$false] %s573_s10 }
  0x13   : > { %v283_v0 = vld [vmem:[%s788_s4] sm:$0xff]  ;;  %v285_v1 = vlaneseq  ;;  %v631_v2 = vmov 0   ;;  %v632_v3 = vmov 1   ;;  %s724_s11 = scalar_select %p264_p10, %s692_s25, 2  ;;  %v284_v4 = vld [vmem:[%s788_s4 + $0x8] sm:$0xff]  ;;  %v633_v11 = vmov 0.0  }
  0x14   : > { %564 = vset.pattern.permute.xlu1 %v631_v2  ;;  %563 = vset.pattern.permute.xlu0 %v632_v3  ;;  %v281_v8 = vld [vmem:[%s787_s3] sm:$0xff]  ;;  %vm634_vm0 = vmmov 0   ;;  %v282_v14 = vld [vmem:[%s787_s3 + $0x8] sm:$0xff]  ;;  %vm361_vm1 = vcmask 130048   ;;  %s575_s25 = scalar_lea.vmem %s574_s10, 32 }
  0x15   : > { %340 = vperm.xlu1 %564, %v283_v0   ;;  %325 = vperm.xlu0 %563, %v283_v0   ;;  %v286_v5 = vshrl.u32 %v285_v1, 7  ;;  %s506_s14 = sshll.u32 %s724_s11, 1  ;;  %s270_s20 = scalar_lea.vmem %s785_s1, %s724_s11  ;;  %v568_v34 = vld [vmem:[%s789_s5] sm:$0xff]  }
  0x16   : > { %s267_s17 = scalar_lea.vmem %s784_s0, %s506_s14  ;;  %v277_v7 = vld [vmem:[%s270_s20] sm:$0x1]  ;;  %514 = vmatprep.subr.bf16.mxu0 %v633_v11  ;;  %516 = vmatprep.mubr.msk.bf16.mxu0 %vm634_vm0, %v633_v11  ;;  %s273_s13 = scalar_lea.vmem %s786_s2, %s724_s11 }
  0x17   : > { %v275_v6 = vld [vmem:[%s267_s17] sm:$0x1]  ;;  %v287_v9 = vsub.s32 0, %v286_v5  ;;  %v276_v15 = vld [vmem:[%s267_s17 + $0x1] sm:$0x1]  ;;  %s263_s17 = scalar_lea.vmem [#allocation2], %s262_s15 }
  0x18   : > { %v278_v10 = vadd.f32 %v277_v7, %v275_v6  ;;  %v279_v16 = vld [vmem:[%s273_s13] sm:$0x1]  ;;  %s429_s18 = sshll.u32 %s263_s17, 4  ;;  %s430_s18 = int_to_ptr.vmem [resolvable:$true] %s429_s18 }
  0x19   : > { %344 = vperm.xlu1 %564, %v284_v4   ;;  %330 = vperm.xlu0 %563, %v284_v4   ;;  %v304_v13 = vrot.slane %v275_v6, %v287_v9  ;;  %v280_v17 = vadd.f32 %v279_v16, %v276_v15  ;;  %v338_v18 = vrot.slane %v276_v15, %v287_v9  ;;  %s569_s29 = scalar_lea.vmem %s430_s18, 16  ;;  %p576_p0 = scmp.lt.s32.totalorder %s430_s18, %s574_s10 }
  0x1a   : > { %v288_v12 = vrot.slane %v278_v10, %v287_v9  ;;  %p570_p11 = scmp.ne.s32.totalorder %s430_s18, %s569_s29  ;;  %p577_p1 = scmp.lt.s32.totalorder %s575_s25, %s569_s29 }
  0x1b   : > { %v322_v19 = vrot.slane %v280_v17, %v287_v9 }
  0x1c   : > { %p571_p12 = pnand %p570_p11, %p709_p5  ;;  %p578_p2 = por %p577_p1, %p576_p0 }
  0x1d   : > { %291 = vperm.xlu0 %563, %v281_v8   ;;  %565 = vset.pattern.permute.xlu1 %v632_v3 }
  0x1e   : > { %296 = vperm.xlu1 %565, %v282_v14   ;;  %p572_p13 = pneg %p571_p12 }
  0x20   : > { %p579_p3 = pnand %p578_p2, %p572_p13 }
  0x21   : > { %566 = vset.pattern.permute.xlu0 %v631_v2 }
  0x22   : > { %306 = vperm.xlu0 %566, %v281_v8   ;;  %567 = vset.pattern.permute.xlu1 %v631_v2 }
  0x23   : > { %310 = vperm.xlu1 %567, %v282_v14  }
  0x90   : > { %v341_v20 = vpop.permute.xlu1 %340  ;;  %v326_v21 = vpop.permute.xlu0 %325 }
  0x91   : > { %v347_v22 = vmax.f32 %v338_v18, %v341_v20  ;;  %v333_v23 = vmin.f32 %v322_v19, %v326_v21 }
  0x93   : > { %v349_v26 = vsub.f32 %v333_v23, %v347_v22 }
  0x94   : > { %v345_v24 = vpop.permute.xlu1 %344  ;;  %v331_v25 = vpop.permute.xlu0 %330 }
  0x95   : > { %v348_v27 = vmax.f32 %v338_v18, %v345_v24  ;;  %v334_v28 = vmin.f32 %v322_v19, %v331_v25  ;;  %v351_v31 = vmax.f32 %v349_v26, 0.0 }
  0x97   : > { %v350_v29 = vsub.f32 %v334_v28, %v348_v27 }
  0x98   : > { %v292_v30 = vpop.permute.xlu0 %291 }
  0x99   : > { %v352_v32 = vmax.f32 %v350_v29, 0.0  ;;  %v297_v35 = vpop.permute.xlu1 %296  ;;  %v299_v37 = vmin.f32 %v288_v12, %v292_v30 }
  0x9a   : > { %v300_v40 = vmin.f32 %v288_v12, %v297_v35 }
  0x9b   : > { %v355_v33 = vpack.c.bf16 %v352_v32, %v351_v31 }
  0x9d   : > { %v307_v36 = vpop.permute.xlu0 %306  ;;  %515 = vmatpush3.bf16.msra.mxu0 %v355_v33 }
  0x9e   : > { %v313_v38 = vmax.f32 %v304_v13, %v307_v36  ;;  %v311_v41 = vpop.permute.xlu1 %310 }
  0x9f   : > { %v314_v42 = vmax.f32 %v304_v13, %v311_v41 }
  0xa0   : > { %v315_v39 = vsub.f32 %v299_v37, %v313_v38  ;;  %517 = vmatmul.mubr.msk.bf16.vlgmr.msra.gmra.mxu0 %vm361_vm1, %v568_v34 }
  0xa1   : > { %v316_v43 = vsub.f32 %v300_v40, %v314_v42 }
  0xa2   : > { %v317_v46 = vmax.f32 %v315_v39, 0.0 }
  0xa3   : > { %v318_v47 = vmax.f32 %v316_v43, 0.0 }
 0x160   : > { %v399_v44 = vpop.f32.mrf.mxu0 }
 0x161   : > { %v406_v49 = vmul.f32 %v399_v44, %v317_v46 }
 0x162   : > { %v518_v45 = vpop.f32.mrf.mxu0 }
 0x164   : > { %v402_v48 = vpop.f32.mrf.mxu0 }
 0x165   : > { %v407_v50 = vmul.f32 %v402_v48, %v318_v47 }
 0x166   : > { %v519_v51 = vpop.f32.mrf.mxu0 }
 0x167   : > { %v408_v52 = vadd.f32 %v407_v50, %v406_v49 }
 0x169   : > { %v409_v53 = vrot.slane %v408_v52, 4 }
 0x16b   : > { %v410_v54 = vadd.f32 %v409_v53, %v408_v52 }
 0x16d   : > { %v411_v55 = vrot.slane %v410_v54, 2 }
 0x16f   : > { %v412_v56 = vadd.f32 %v411_v55, %v410_v54 }
 0x171   : > { %v413_v57 = vrot.slane %v412_v56, 1 }
 0x173   : > { %v414_v58 = vadd.f32 %v413_v57, %v412_v56 }
 0x175   : > { %415 = vst [vmem:[%s263_s17] sm:$0x1] %v414_v58 }
 0x176   : > { %582 = shalt.err (!%p579_p3)
}
 0x177   : > { %s583_s12 = scalar_lea.hbm %s427_s26, 16  ;;  %s587_s14 = scalar_lea.hbm %s790_s6, 32 }
 0x178   : > { %p584_p4 = scmp.ne.s32.totalorder %s427_s26, %s583_s12  ;;  %p588_p9 = scmp.lt.s32.totalorder %s427_s26, %s790_s6 }
 0x179   : > { %p589_p10 = scmp.lt.s32.totalorder %s587_s14, %s583_s12 }
 0x17a   : > { %p585_p7 = pnand %p584_p4, %p709_p5 }
 0x17b   : > { %p590_p11 = por %p589_p10, %p588_p9 }
 0x17c   : > { %p586_p8 = pneg %p585_p7 }
 0x17e   : > { %p591_p12 = pnand %p590_p11, %p586_p8 }
 0x180   : > { %594 = shalt.err (!%p591_p12)
}
 0x181   : > { %520 = dma.vmem_to_hbm [thread:$0]  (%p709_p5), %s430_s18, 16, %s427_s26, %s417_s28  }
 0x182 PF: > { %p526_p13 = scmp.ge.s32.totalorder %s629_s24, 2  ;;  %s441_s17 = sand.u32 1, %s617_s21  }
 0x183   : > { %s442_s19 = scalar_lea.sflag [#allocation3], %s441_s17 }
 0x184   : > { %p523_p0 = pnand %p526_p13, %p713_p6 }
 0x186   : > { %p524_p1 = pneg %p523_p0 }
 0x188   : > { %612 = dma.done.wait (%p524_p1), %s442_s19, 16  }
 0x189   : > { %614 = vsyncadd (%p524_p1), %s442_s19, 4294967280  ;;  %p16_p2 = scmp.ge.s32.totalorder %s696_s27, 4   ;;  %s793_s21 = smov %s621_s22 }
 0x18a   : > { %s794_s22 = smov %s625_s23  ;;  %s795_s23 = smov %s707_s30 }
 0x18b   : > { %s796_s24 = smov %s696_s27  ;;  %18 = sbr.rel (!%p16_p2) target bundleno = 3 (0x3), region = 85 }
 0x190   :  { %446 = vsyncpa [#allocation3], 1 }
 0x191   :  { %448 = vsyncpa [#allocation3 + $0x1], 1 }

// kernel: tpu_custom_call.1
= control target key start
LH: loop header
LB: loop body
LE: loop exit
PB: predicated region body
PF: predicated region fallthrough
CT: control target
= control target key end

     0   :  { %11 = vsyncpa [#allocation3], 0  ;;  %s784_s0 = inlined_call_operand.vmem [shape: f32[2,300], index: 0, kind: input, shape index: {}]   ;;  %s785_s1 = inlined_call_operand.vmem [shape: f32[1,300], index: 1, kind: input, shape index: {}]   ;;  %s786_s2 = inlined_call_operand.vmem [shape: f32[1,300], index: 2, kind: input, shape index: {}]   ;;  %s787_s3 = inlined_call_operand.vmem [shape: f32[16,2], index: 3, kind: input, shape index: {}]   ;;  %s788_s4 = inlined_call_operand.vmem [shape: f32[16,2], index: 4, kind: input, shape index: {}]   ;;  %s789_s5 = inlined_call_operand.vmem [shape: bf16[16,16], index: 5, kind: input, shape index: {}]   ;;  %s790_s6 = inlined_call_operand.hbm [shape: f32[1,200], index: 6, kind: output, shape index: {}]  }
   0x1   :  { %13 = vsyncpa [#allocation3 + $0x1], 0  ;;  %s671_s21 = smov 0   ;;  %s673_s22 = smov 0  }
   0x2   :  { %s675_s23 = smov 0   ;;  %s677_s24 = smov 0  }
   0x3 LB: > { %s692_s25 = sadd.s32 4294967295, %s629_s24   ;;  %s502_s26 = sadd.s32 4294967294, %s629_s24   ;;  %s629_s24 = sphi %s677_s24, %s796_s24   ;;  %s625_s23 = sphi %s675_s23, %s795_s23   ;;  %s621_s22 = sphi %s673_s22, %s794_s22   ;;  %s617_s21 = sphi %s671_s21, %s793_s21  }
   0x4   : > { %s696_s27 = sadd.s32 1, %s629_s24   ;;  %s167_s28 = sadd.s32 1, %s625_s23 }
   0x5   : > { %s164_s29 = ssub.s32 %s629_s24, %s696_s27  ;;  %p177_p0 = scmp.ne.s32.totalorder %s625_s23, %s621_s22 }
   0x6   : > { %p165_p1 = scmp.eq.s32.totalorder %s164_s29, 0  ;;  %p178_p2 = scmp.eq.s32.totalorder %s692_s25, 1 }
   0x7   : > { %p183_p3 = scmp.ne.s32.totalorder %s621_s22, %s617_s21  ;;  %p184_p4 = scmp.eq.s32.totalorder %s502_s26, 1 }
   0x8   : > { %s707_s30 = scalar_select %p165_p1, %s625_s23, %s167_s28  }
   0x9   : > { %p709_p5 = por %p178_p2, %p177_p0  ;;  %p713_p6 = por %p184_p4, %p183_p3 }
   0xa   : > { %p505_p7 = scmp.ge.s32.totalorder %s629_s24, 1  ;;  %p230_p8 = scmp.lt.s32.totalorder %s629_s24, 3 }
   0xc   : > { %p231_p9 = pnand %p505_p7, %p230_p8 }
   0xd   : > { %p264_p10 = scmp.lt.s32.totalorder (!%p231_p9), %s692_s25, 2  ;;  %s262_s15 = sand.u32 (!%p231_p9), 1, %s621_s22  }
   0xe   : > { %234 = sbr.rel (%p231_p9) target bundleno = 386 (0x182), region = 44  ;;  %s509_s16 = sshll.u32 (!%p231_p9), %s692_s25, 4 }
   0xf   : > { %s427_s26 = scalar_lea.hbm (!%p231_p9), %s790_s6, %s509_s16  ;;  %s417_s28 = scalar_lea.sflag (!%p231_p9), [#allocation3], %s262_s15 }
  0x10   : > { %s635_s9 = smov (!%p231_p9), [#allocation2]  }
  0x11   : > { %s573_s10 = sshll.u32 (!%p231_p9), %s635_s9, 4  ;;  %s574_s10 = int_to_ptr.vmem [resolvable:$false] %s573_s10 }
  0x13   : > { %v283_v0 = vld [vmem:[%s788_s4] sm:$0xff]  ;;  %v285_v1 = vlaneseq  ;;  %v631_v2 = vmov 0   ;;  %v632_v3 = vmov 1   ;;  %s724_s11 = scalar_select %p264_p10, %s692_s25, 2  ;;  %v284_v4 = vld [vmem:[%s788_s4 + $0x8] sm:$0xff]  ;;  %v633_v11 = vmov 0.0  }
  0x14   : > { %564 = vset.pattern.permute.xlu1 %v631_v2  ;;  %563 = vset.pattern.permute.xlu0 %v632_v3  ;;  %v281_v8 = vld [vmem:[%s787_s3] sm:$0xff]  ;;  %vm634_vm0 = vmmov 0   ;;  %v282_v14 = vld [vmem:[%s787_s3 + $0x8] sm:$0xff]  ;;  %vm361_vm1 = vcmask 130048   ;;  %s575_s25 = scalar_lea.vmem %s574_s10, 32 }
  0x15   : > { %340 = vperm.xlu1 %564, %v283_v0   ;;  %325 = vperm.xlu0 %563, %v283_v0   ;;  %v286_v5 = vshrl.u32 %v285_v1, 7  ;;  %s506_s14 = sshll.u32 %s724_s11, 1  ;;  %s270_s20 = scalar_lea.vmem %s785_s1, %s724_s11  ;;  %v568_v34 = vld [vmem:[%s789_s5] sm:$0xff]  }
  0x16   : > { %s267_s17 = scalar_lea.vmem %s784_s0, %s506_s14  ;;  %v277_v7 = vld [vmem:[%s270_s20] sm:$0x1]  ;;  %514 = vmatprep.subr.bf16.mxu0 %v633_v11  ;;  %516 = vmatprep.mubr.msk.bf16.mxu0 %vm634_vm0, %v633_v11  ;;  %s273_s13 = scalar_lea.vmem %s786_s2, %s724_s11 }
  0x17   : > { %v275_v6 = vld [vmem:[%s267_s17] sm:$0x1]  ;;  %v287_v9 = vsub.s32 0, %v286_v5  ;;  %v276_v15 = vld [vmem:[%s267_s17 + $0x1] sm:$0x1]  ;;  %s263_s17 = scalar_lea.vmem [#allocation2], %s262_s15 }
  0x18   : > { %v278_v10 = vadd.f32 %v277_v7, %v275_v6  ;;  %v279_v16 = vld [vmem:[%s273_s13] sm:$0x1]  ;;  %s429_s18 = sshll.u32 %s263_s17, 4  ;;  %s430_s18 = int_to_ptr.vmem [resolvable:$true] %s429_s18 }
  0x19   : > { %344 = vperm.xlu1 %564, %v284_v4   ;;  %330 = vperm.xlu0 %563, %v284_v4   ;;  %v304_v13 = vrot.slane %v275_v6, %v287_v9  ;;  %v280_v17 = vadd.f32 %v279_v16, %v276_v15  ;;  %v338_v18 = vrot.slane %v276_v15, %v287_v9  ;;  %s569_s29 = scalar_lea.vmem %s430_s18, 16  ;;  %p576_p0 = scmp.lt.s32.totalorder %s430_s18, %s574_s10 }
  0x1a   : > { %v288_v12 = vrot.slane %v278_v10, %v287_v9  ;;  %p570_p11 = scmp.ne.s32.totalorder %s430_s18, %s569_s29  ;;  %p577_p1 = scmp.lt.s32.totalorder %s575_s25, %s569_s29 }
  0x1b   : > { %v322_v19 = vrot.slane %v280_v17, %v287_v9 }
  0x1c   : > { %p571_p12 = pnand %p570_p11, %p709_p5  ;;  %p578_p2 = por %p577_p1, %p576_p0 }
  0x1d   : > { %291 = vperm.xlu0 %563, %v281_v8   ;;  %565 = vset.pattern.permute.xlu1 %v632_v3 }
  0x1e   : > { %296 = vperm.xlu1 %565, %v282_v14   ;;  %p572_p13 = pneg %p571_p12 }
  0x20   : > { %p579_p3 = pnand %p578_p2, %p572_p13 }
  0x21   : > { %566 = vset.pattern.permute.xlu0 %v631_v2 }
  0x22   : > { %306 = vperm.xlu0 %566, %v281_v8   ;;  %567 = vset.pattern.permute.xlu1 %v631_v2 }
  0x23   : > { %310 = vperm.xlu1 %567, %v282_v14  }
  0x90   : > { %v341_v20 = vpop.permute.xlu1 %340  ;;  %v326_v21 = vpop.permute.xlu0 %325 }
  0x91   : > { %v347_v22 = vmax.f32 %v338_v18, %v341_v20  ;;  %v333_v23 = vmin.f32 %v322_v19, %v326_v21 }
  0x93   : > { %v349_v26 = vsub.f32 %v333_v23, %v347_v22 }
  0x94   : > { %v345_v24 = vpop.permute.xlu1 %344  ;;  %v331_v25 = vpop.permute.xlu0 %330 }
  0x95   : > { %v348_v27 = vmax.f32 %v338_v18, %v345_v24  ;;  %v334_v28 = vmin.f32 %v322_v19, %v331_v25  ;;  %v351_v31 = vmax.f32 %v349_v26, 0.0 }
  0x97   : > { %v350_v29 = vsub.f32 %v334_v28, %v348_v27 }
  0x98   : > { %v292_v30 = vpop.permute.xlu0 %291 }
  0x99   : > { %v352_v32 = vmax.f32 %v350_v29, 0.0  ;;  %v297_v35 = vpop.permute.xlu1 %296  ;;  %v299_v37 = vmin.f32 %v288_v12, %v292_v30 }
  0x9a   : > { %v300_v40 = vmin.f32 %v288_v12, %v297_v35 }
  0x9b   : > { %v355_v33 = vpack.c.bf16 %v352_v32, %v351_v31 }
  0x9d   : > { %v307_v36 = vpop.permute.xlu0 %306  ;;  %515 = vmatpush3.bf16.msra.mxu0 %v355_v33 }
  0x9e   : > { %v313_v38 = vmax.f32 %v304_v13, %v307_v36  ;;  %v311_v41 = vpop.permute.xlu1 %310 }
  0x9f   : > { %v314_v42 = vmax.f32 %v304_v13, %v311_v41 }
  0xa0   : > { %v315_v39 = vsub.f32 %v299_v37, %v313_v38  ;;  %517 = vmatmul.mubr.msk.bf16.vlgmr.msra.gmra.mxu0 %vm361_vm1, %v568_v34 }
  0xa1   : > { %v316_v43 = vsub.f32 %v300_v40, %v314_v42 }
  0xa2   : > { %v317_v46 = vmax.f32 %v315_v39, 0.0 }
  0xa3   : > { %v318_v47 = vmax.f32 %v316_v43, 0.0 }
 0x160   : > { %v399_v44 = vpop.f32.mrf.mxu0 }
 0x161   : > { %v406_v49 = vmul.f32 %v399_v44, %v317_v46 }
 0x162   : > { %v518_v45 = vpop.f32.mrf.mxu0 }
 0x164   : > { %v402_v48 = vpop.f32.mrf.mxu0 }
 0x165   : > { %v407_v50 = vmul.f32 %v402_v48, %v318_v47 }
 0x166   : > { %v519_v51 = vpop.f32.mrf.mxu0 }
 0x167   : > { %v408_v52 = vadd.f32 %v407_v50, %v406_v49 }
 0x169   : > { %v409_v53 = vrot.slane %v408_v52, 4 }
 0x16b   : > { %v410_v54 = vadd.f32 %v409_v53, %v408_v52 }
 0x16d   : > { %v411_v55 = vrot.slane %v410_v54, 2 }
 0x16f   : > { %v412_v56 = vadd.f32 %v411_v55, %v410_v54 }
 0x171   : > { %v413_v57 = vrot.slane %v412_v56, 1 }
 0x173   : > { %v414_v58 = vadd.f32 %v413_v57, %v412_v56 }
 0x175   : > { %415 = vst [vmem:[%s263_s17] sm:$0x1] %v414_v58 }
 0x176   : > { %582 = shalt.err (!%p579_p3)
}
 0x177   : > { %s583_s12 = scalar_lea.hbm %s427_s26, 16  ;;  %s587_s14 = scalar_lea.hbm %s790_s6, 32 }
 0x178   : > { %p584_p4 = scmp.ne.s32.totalorder %s427_s26, %s583_s12  ;;  %p588_p9 = scmp.lt.s32.totalorder %s427_s26, %s790_s6 }
 0x179   : > { %p589_p10 = scmp.lt.s32.totalorder %s587_s14, %s583_s12 }
 0x17a   : > { %p585_p7 = pnand %p584_p4, %p709_p5 }
 0x17b   : > { %p590_p11 = por %p589_p10, %p588_p9 }
 0x17c   : > { %p586_p8 = pneg %p585_p7 }
 0x17e   : > { %p591_p12 = pnand %p590_p11, %p586_p8 }
 0x180   : > { %594 = shalt.err (!%p591_p12)
}
 0x181   : > { %520 = dma.vmem_to_hbm [thread:$0]  (%p709_p5), %s430_s18, 16, %s427_s26, %s417_s28  }
 0x182 PF: > { %p526_p13 = scmp.ge.s32.totalorder %s629_s24, 2  ;;  %s441_s17 = sand.u32 1, %s617_s21  }
 0x183   : > { %s442_s19 = scalar_lea.sflag [#allocation3], %s441_s17 }
 0x184   : > { %p523_p0 = pnand %p526_p13, %p713_p6 }
 0x186   : > { %p524_p1 = pneg %p523_p0 }
 0x188   : > { %612 = dma.done.wait (%p524_p1), %s442_s19, 16  }
 0x189   : > { %614 = vsyncadd (%p524_p1), %s442_s19, 4294967280  ;;  %p16_p2 = scmp.ge.s32.totalorder %s696_s27, 4   ;;  %s793_s21 = smov %s621_s22 }
 0x18a   : > { %s794_s22 = smov %s625_s23  ;;  %s795_s23 = smov %s707_s30 }
 0x18b   : > { %s796_s24 = smov %s696_s27  ;;  %18 = sbr.rel (!%p16_p2) target bundleno = 3 (0x3), region = 85 }
 0x190   :  { %446 = vsyncpa [#allocation3], 1 }
 0x191   :  { %448 = vsyncpa [#allocation3 + $0x1], 1 }

</bundles_post_ra>
